<compile_context>
chip_gen: v7x
topology: tpu7x:2x2x1
jax: 0.10.0
libtpu: 0.0.40
codegen_flags: <defaults>
</compile_context>

<pallas_src>
import math
from functools import partial

import jax
import jax.numpy as jnp
from jax import lax
from jax.experimental import pallas as pl
from jax.experimental.pallas import tpu as pltpu

# ----- deterministic stand-in for networkDesc / dict_params -----------------
OUT_CHANNELS = 8      # dict_params[...]["out_channels"]
KERNEL_SIZE = 3       # dict_params[...]["kernel_size"]
STRIDE = 1            # dict_params[...]["stride"]
IN_CHANNELS = 3
IMG = 32              # module hard-codes 32x32 inputs via the fc1 sizing
NUM_CLASSES = 10

assert STRIDE == 1, "flat-coordinate im2col / pool / FC-scatter math assumes stride 1"

H_CONV = (IMG - KERNEL_SIZE) // STRIDE + 1                       # 30
TAILLE = int(math.ceil((IMG - KERNEL_SIZE + 1) / STRIDE) / 2)    # 15
H_POOL = H_CONV // 2                                             # 15
assert TAILLE == H_POOL, "chosen (k, stride) must make fc1 sizing consistent"
FC_IN = OUT_CHANNELS * TAILLE * TAILLE                           # 1800

# Flat-spatial ("h*IMG + w") layout constants, now padded to (8,128) tiles.
KK = KERNEL_SIZE * KERNEL_SIZE                                   # 9 conv taps
K_ROWS = KK * IN_CHANNELS                                        # 27 im2col rows
K_PAD = -(-K_ROWS // 8) * 8                                      # 32 (sublane pad)
ACCW = (H_CONV - 1) * IMG + H_CONV                               # 958 valid conv pos
PFW = 2 * (H_POOL - 1) * (IMG + 1) + 1                           # 925 pool top-lefts
PFW_PAD = -(-PFW // 128) * 128                                   # 1024
ACCW_PAD = -(-max(ACCW, PFW_PAD + IMG + 1) // 128) * 128         # 1152
FLAT_PAD = ACCW_PAD + (KERNEL_SIZE - 1) * (IMG + 1) - IMG * IMG  # 194
assert FLAT_PAD >= 0
assert IMG + 1 + PFW_PAD <= ACCW_PAD                             # pool shifts fit


# ----------------------------- fused Pallas kernel ---------------------------
def _fused_forward_kernel(slab_ref, w27_ref, bc_ref, wl_ref, bf_ref, o_ref, *, bb):
    # slab_ref: (bb, K_PAD, ACCW_PAD)  pre-shifted im2col rows (tap-major, cin-minor)
    # w27_ref : (Cout, K_PAD)          conv weight repacked to a single K=27(->32) matmul
    # bc_ref  : (Cout, 1)              conv bias (channels on sublanes)
    # wl_ref  : (Cout, 10, PFW_PAD)    fc1 weight, lane-dense + zero-scattered
    # bf_ref  : (10, 1)                fc1 bias (classes on sublanes)
    # o_ref   : (bb, 10, 1)            logits (classes on sublanes; wrapper reshapes)
    w27 = w27_ref[...]
    bc = bc_ref[...]
    bf = bf_ref[...]
    for b in range(bb):  # static unroll: amortize per-grid-step overhead over bb images
        # ---- conv as ONE MXU matmul over the pre-shifted, lane-aligned slab
        acc = jnp.dot(w27, slab_ref[b], preferred_element_type=jnp.float32)  # (Cout, ACCW_PAD)

        # ---- bias + ReLU (per-channel broadcast along lanes)
        a = jnp.maximum(acc + bc, 0.0)

        # ---- 2x2 / stride-2 max pool on the flat layout: window top-left q uses
        #      positions q, q+1, q+IMG, q+IMG+1.  Only 3 shifted views remain.
        pf = jnp.maximum(
            jnp.maximum(a[:, 0:PFW_PAD], a[:, 1:PFW_PAD + 1]),
            jnp.maximum(a[:, IMG:IMG + PFW_PAD], a[:, IMG + 1:IMG + 1 + PFW_PAD]),
        )                                                        # (Cout, PFW_PAD)

        # ---- flatten + fc1 on the VPU: lane-dense zero-scattered weights, one
        #      broadcast-multiply + accumulate per channel, ONE lane reduction.
        fc = None
        for c in range(OUT_CHANNELS):
            term = pf[c:c + 1, :] * wl_ref[c]                    # (10, PFW_PAD)
            fc = term if fc is None else fc + term
        logits = jnp.sum(fc, axis=-1, keepdims=True) + bf        # (10, 1)
        o_ref[b] = logits


# ------------------------------ wrapper ---------------------------------------
def _build_im2col(x):
    """x: (N, Cin, IMG, IMG) -> pre-shifted im2col slab (N, K_PAD, ACCW_PAD)."""
    n = x.shape[0]
    xf = x.reshape(n, IN_CHANNELS, IMG * IMG).astype(jnp.float32)
    xf = jnp.pad(xf, ((0, 0), (0, 0), (0, FLAT_PAD)))            # keep shifts in range
    rows = [xf[:, :, kh * IMG + kw: kh * IMG + kw + ACCW_PAD]
            for kh in range(KERNEL_SIZE) for kw in range(KERNEL_SIZE)]
    slab = jnp.concatenate(rows, axis=1)                         # (N, 27, ACCW_PAD)
    return jnp.pad(slab, ((0, 0), (0, K_PAD - K_ROWS), (0, 0)))  # (N, 32, ACCW_PAD)


def conv_network_forward(x, kparams, batch_block=None):
    """x: (N, 3, 32, 32) NCHW float32; kparams: output of prepare_kernel_params."""
    n = x.shape[0]
    bb = batch_block if batch_block is not None else (1 if n < 4 else 4)
    g = -(-n // bb)
    n_pad = g * bb

    slab = _build_im2col(x)
    if n_pad != n:
        slab = jnp.pad(slab, ((0, n_pad - n), (0, 0), (0, 0)))

    out = pl.pallas_call(
        partial(_fused_forward_kernel, bb=bb),
        out_shape=jax.ShapeDtypeStruct((n_pad, NUM_CLASSES, 1), jnp.float32),
        grid=(g,),
        in_specs=[
            pl.BlockSpec((bb, K_PAD, ACCW_PAD), lambda i: (i, 0, 0)),
            pl.BlockSpec((OUT_CHANNELS, K_PAD), lambda i: (0, 0)),
            pl.BlockSpec((OUT_CHANNELS, 1), lambda i: (0, 0)),
            pl.BlockSpec((OUT_CHANNELS, NUM_CLASSES, PFW_PAD), lambda i: (0, 0, 0)),
            pl.BlockSpec((NUM_CLASSES, 1), lambda i: (0, 0)),
        ],
        out_specs=pl.BlockSpec((bb, NUM_CLASSES, 1), lambda i: (i, 0, 0)),
        compiler_params=pltpu.CompilerParams(
            dimension_semantics=("parallel",)),   # v7x: shard batch blocks across 2 TCs
    )(slab, kparams["w27"], kparams["b_conv"], kparams["w_lane"], kparams["b_fc"])
    return out[:n, :, 0]


# ---------------------- one-time weight repacking (outside jit) ---------------
def prepare_kernel_params(params):
    c, hp, k = OUT_CHANNELS, H_POOL, KERNEL_SIZE
    # conv weight (Cout, Cin, k, k) -> (Cout, 27) tap-major / cin-minor, pad K to 32
    w27 = jnp.transpose(params["w_conv"], (0, 2, 3, 1)).reshape(c, KK * IN_CHANNELS)
    w27 = jnp.pad(w27.astype(jnp.float32), ((0, 0), (0, K_PAD - K_ROWS)))
    b_conv = params["b_conv"].reshape(c, 1).astype(jnp.float32)
    # fc1 weight (10, C*HP*HP) in PyTorch NCHW-flatten order -> lane-dense
    # (C, 10, PFW_PAD), scattered to flat pool coordinate q = 2i*IMG + 2j
    # (exact zeros everywhere else, incl. the 128-pad tail).
    w4 = params["w_fc"].reshape(NUM_CLASSES, c, hp, hp)
    w4 = jnp.transpose(w4, (1, 0, 2, 3)).reshape(c, NUM_CLASSES, hp * hp).astype(jnp.float32)
    q_idx = (2 * jnp.arange(hp)[:, None] * IMG + 2 * jnp.arange(hp)[None, :]).reshape(-1)
    w_lane = jnp.zeros((c, NUM_CLASSES, PFW_PAD), jnp.float32).at[:, :, q_idx].set(w4)
    b_fc = params["b_fc"].reshape(NUM_CLASSES, 1).astype(jnp.float32)
    return {"w27": w27, "b_conv": b_conv, "w_lane": w_lane, "b_fc": b_fc}


# ------------------------------ reference & init ------------------------------
def reference_forward(x, params):
    y = lax.conv_general_dilated(
        x, params["w_conv"], (STRIDE, STRIDE), "VALID",
        dimension_numbers=("NCHW", "OIHW", "NCHW"))
    y = jnp.maximum(y + params["b_conv"].reshape(1, -1, 1, 1), 0.0)
    y = lax.reduce_window(y, -jnp.inf, lax.max, (1, 1, 2, 2), (1, 1, 2, 2), "VALID")
    y = y.reshape(x.shape[0], -1)
    return y @ params["w_fc"].T + params["b_fc"]


def init_params(key):
    k1, k2, k3, k4 = jax.random.split(key, 4)
    return {
        "w_conv": 0.1 * jax.random.normal(
            k1, (OUT_CHANNELS, IN_CHANNELS, KERNEL_SIZE, KERNEL_SIZE), jnp.float32),
        "b_conv": 0.1 * jax.random.normal(k2, (OUT_CHANNELS,), jnp.float32),
        "w_fc": 0.05 * jax.random.normal(k3, (NUM_CLASSES, FC_IN), jnp.float32),
        "b_fc": 0.05 * jax.random.normal(k4, (NUM_CLASSES,), jnp.float32),
    }


if __name__ == "__main__":
    key = jax.random.PRNGKey(0)
    pkey, xkey, xkey2 = jax.random.split(key, 3)
    params = init_params(pkey)
    kparams = prepare_kernel_params(params)     # host-side / outside jit, once

    fwd = jax.jit(conv_network_forward, static_argnames=("batch_block",))

    # primary check: batch=2, one image per grid step ("parallel" across TCs on v7x)
    x = jax.random.normal(xkey, (2, IN_CHANNELS, IMG, IMG), jnp.float32)
    out = jax.block_until_ready(fwd(x, kparams))
    ref = reference_forward(x, params)
    assert out.shape == (2, NUM_CLASSES)
    assert jnp.allclose(out, ref, atol=2e-4, rtol=2e-4), "mismatch vs reference (N=2)"

    # secondary check: exercise the batch-blocked path (BB=2) with N not a multiple of BB
    x2 = jax.random.normal(xkey2, (5, IN_CHANNELS, IMG, IMG), jnp.float32)
    out2 = jax.block_until_ready(fwd(x2, kparams, batch_block=2))
    ref2 = reference_forward(x2, params)
    assert out2.shape == (5, NUM_CLASSES)
    assert jnp.allclose(out2, ref2, atol=2e-4, rtol=2e-4), "mismatch vs reference (N=5, BB=2)"

    print("KERNEL_OK")
</pallas_src>

<mosaic_0001>
module attributes {stable_mosaic.version = 11 : i64} {
  func.func @_fused_forward_kernel(%arg0: i32, %arg1: memref<1x32x1152xf32, #tpu.memory_space<vmem>>, %arg2: memref<8x32xf32, #tpu.memory_space<vmem>>, %arg3: memref<8x1xf32, #tpu.memory_space<vmem>>, %arg4: memref<8x10x1024xf32, #tpu.memory_space<vmem>>, %arg5: memref<10x1xf32, #tpu.memory_space<vmem>>, %arg6: memref<1x10x1xf32, #tpu.memory_space<vmem>>) attributes {dimension_semantics = [#tpu.dimension_semantics<parallel>], iteration_bounds = array<i64: 2>, scalar_prefetch = 0 : i64, scratch_operands = 0 : i64, tpu.core_type = #tpu.core_type<tc>, window_params = [{transform_indices = @transform_0, window_bounds = array<i64: 1, 32, 1152>}, {pipeline_mode = #tpu.pipeline_mode<synchronous>, transform_indices = @transform_1, window_bounds = array<i64: 8, 32>}, {pipeline_mode = #tpu.pipeline_mode<synchronous>, transform_indices = @transform_2, window_bounds = array<i64: 8, 1>}, {pipeline_mode = #tpu.pipeline_mode<synchronous>, transform_indices = @transform_3, window_bounds = array<i64: 8, 10, 1024>}, {pipeline_mode = #tpu.pipeline_mode<synchronous>, transform_indices = @transform_4, window_bounds = array<i64: 10, 1>}, {transform_indices = @transform_5, window_bounds = array<i64: 1, 10, 1>}]} {
    %c0 = arith.constant 0 : index
    %c0_0 = arith.constant 0 : index
    %0 = vector.load %arg2[%c0, %c0_0] : memref<8x32xf32, #tpu.memory_space<vmem>>, vector<8x32xf32>
    %c0_1 = arith.constant 0 : index
    %c0_2 = arith.constant 0 : index
    %1 = vector.load %arg3[%c0_1, %c0_2] : memref<8x1xf32, #tpu.memory_space<vmem>>, vector<8x1xf32>
    %c0_3 = arith.constant 0 : index
    %c0_4 = arith.constant 0 : index
    %2 = vector.load %arg5[%c0_3, %c0_4] : memref<10x1xf32, #tpu.memory_space<vmem>>, vector<10x1xf32>
    %c0_5 = arith.constant 0 : index
    %c0_6 = arith.constant 0 : index
    %c0_7 = arith.constant 0 : index
    %3 = vector.load %arg1[%c0_5, %c0_6, %c0_7] : memref<1x32x1152xf32, #tpu.memory_space<vmem>>, vector<1x32x1152xf32>
    %4 = vector.shape_cast %3 : vector<1x32x1152xf32> to vector<32x1152xf32>
    %cst = arith.constant dense<0.000000e+00> : vector<8x1152xf32>
    %5 = tpu.matmul %0, %4, %cst {dimension_numbers = #tpu.dot_dimension_numbers<[1], [0], [0], [1], [0, 0, 1, 1], [], []>} : vector<8x32xf32>, vector<32x1152xf32>, vector<8x1152xf32> -> vector<8x1152xf32>
    %6 = vector.broadcast %1 : vector<8x1xf32> to vector<8x1152xf32>
    %7 = arith.addf %5, %6 : vector<8x1152xf32>
    %cst_8 = arith.constant 0.000000e+00 : f32
    %8 = vector.broadcast %cst_8 : f32 to vector<8x1152xf32>
    %9 = arith.maximumf %7, %8 : vector<8x1152xf32>
    %10 = vector.extract_strided_slice %9 {offsets = [0, 0], sizes = [8, 1024], strides = [1, 1]} : vector<8x1152xf32> to vector<8x1024xf32>
    %11 = vector.extract_strided_slice %9 {offsets = [0, 1], sizes = [8, 1024], strides = [1, 1]} : vector<8x1152xf32> to vector<8x1024xf32>
    %12 = arith.maximumf %10, %11 : vector<8x1024xf32>
    %13 = vector.extract_strided_slice %9 {offsets = [0, 32], sizes = [8, 1024], strides = [1, 1]} : vector<8x1152xf32> to vector<8x1024xf32>
    %14 = vector.extract_strided_slice %9 {offsets = [0, 33], sizes = [8, 1024], strides = [1, 1]} : vector<8x1152xf32> to vector<8x1024xf32>
    %15 = arith.maximumf %13, %14 : vector<8x1024xf32>
    %16 = arith.maximumf %12, %15 : vector<8x1024xf32>
    %17 = vector.extract_strided_slice %16 {offsets = [0, 0], sizes = [1, 1024], strides = [1, 1]} : vector<8x1024xf32> to vector<1x1024xf32>
    %c0_9 = arith.constant 0 : index
    %c0_10 = arith.constant 0 : index
    %c0_11 = arith.constant 0 : index
    %18 = vector.load %arg4[%c0_9, %c0_10, %c0_11] : memref<8x10x1024xf32, #tpu.memory_space<vmem>>, vector<1x10x1024xf32>
    %19 = vector.shape_cast %18 : vector<1x10x1024xf32> to vector<10x1024xf32>
    %20 = vector.broadcast %17 : vector<1x1024xf32> to vector<10x1024xf32>
    %21 = arith.mulf %20, %19 : vector<10x1024xf32>
    %22 = vector.extract_strided_slice %16 {offsets = [1, 0], sizes = [1, 1024], strides = [1, 1]} : vector<8x1024xf32> to vector<1x1024xf32>
    %c1 = arith.constant 1 : index
    %c0_12 = arith.constant 0 : index
    %c0_13 = arith.constant 0 : index
    %23 = vector.load %arg4[%c1, %c0_12, %c0_13] : memref<8x10x1024xf32, #tpu.memory_space<vmem>>, vector<1x10x1024xf32>
    %24 = vector.shape_cast %23 : vector<1x10x1024xf32> to vector<10x1024xf32>
    %25 = vector.broadcast %22 : vector<1x1024xf32> to vector<10x1024xf32>
    %26 = arith.mulf %25, %24 : vector<10x1024xf32>
    %27 = arith.addf %21, %26 : vector<10x1024xf32>
    %28 = vector.extract_strided_slice %16 {offsets = [2, 0], sizes = [1, 1024], strides = [1, 1]} : vector<8x1024xf32> to vector<1x1024xf32>
    %c2 = arith.constant 2 : index
    %c0_14 = arith.constant 0 : index
    %c0_15 = arith.constant 0 : index
    %29 = vector.load %arg4[%c2, %c0_14, %c0_15] : memref<8x10x1024xf32, #tpu.memory_space<vmem>>, vector<1x10x1024xf32>
    %30 = vector.shape_cast %29 : vector<1x10x1024xf32> to vector<10x1024xf32>
    %31 = vector.broadcast %28 : vector<1x1024xf32> to vector<10x1024xf32>
    %32 = arith.mulf %31, %30 : vector<10x1024xf32>
    %33 = arith.addf %27, %32 : vector<10x1024xf32>
    %34 = vector.extract_strided_slice %16 {offsets = [3, 0], sizes = [1, 1024], strides = [1, 1]} : vector<8x1024xf32> to vector<1x1024xf32>
    %c3 = arith.constant 3 : index
    %c0_16 = arith.constant 0 : index
    %c0_17 = arith.constant 0 : index
    %35 = vector.load %arg4[%c3, %c0_16, %c0_17] : memref<8x10x1024xf32, #tpu.memory_space<vmem>>, vector<1x10x1024xf32>
    %36 = vector.shape_cast %35 : vector<1x10x1024xf32> to vector<10x1024xf32>
    %37 = vector.broadcast %34 : vector<1x1024xf32> to vector<10x1024xf32>
    %38 = arith.mulf %37, %36 : vector<10x1024xf32>
    %39 = arith.addf %33, %38 : vector<10x1024xf32>
    %40 = vector.extract_strided_slice %16 {offsets = [4, 0], sizes = [1, 1024], strides = [1, 1]} : vector<8x1024xf32> to vector<1x1024xf32>
    %c4 = arith.constant 4 : index
    %c0_18 = arith.constant 0 : index
    %c0_19 = arith.constant 0 : index
    %41 = vector.load %arg4[%c4, %c0_18, %c0_19] : memref<8x10x1024xf32, #tpu.memory_space<vmem>>, vector<1x10x1024xf32>
    %42 = vector.shape_cast %41 : vector<1x10x1024xf32> to vector<10x1024xf32>
    %43 = vector.broadcast %40 : vector<1x1024xf32> to vector<10x1024xf32>
    %44 = arith.mulf %43, %42 : vector<10x1024xf32>
    %45 = arith.addf %39, %44 : vector<10x1024xf32>
    %46 = vector.extract_strided_slice %16 {offsets = [5, 0], sizes = [1, 1024], strides = [1, 1]} : vector<8x1024xf32> to vector<1x1024xf32>
    %c5 = arith.constant 5 : index
    %c0_20 = arith.constant 0 : index
    %c0_21 = arith.constant 0 : index
    %47 = vector.load %arg4[%c5, %c0_20, %c0_21] : memref<8x10x1024xf32, #tpu.memory_space<vmem>>, vector<1x10x1024xf32>
    %48 = vector.shape_cast %47 : vector<1x10x1024xf32> to vector<10x1024xf32>
    %49 = vector.broadcast %46 : vector<1x1024xf32> to vector<10x1024xf32>
    %50 = arith.mulf %49, %48 : vector<10x1024xf32>
    %51 = arith.addf %45, %50 : vector<10x1024xf32>
    %52 = vector.extract_strided_slice %16 {offsets = [6, 0], sizes = [1, 1024], strides = [1, 1]} : vector<8x1024xf32> to vector<1x1024xf32>
    %c6 = arith.constant 6 : index
    %c0_22 = arith.constant 0 : index
    %c0_23 = arith.constant 0 : index
    %53 = vector.load %arg4[%c6, %c0_22, %c0_23] : memref<8x10x1024xf32, #tpu.memory_space<vmem>>, vector<1x10x1024xf32>
    %54 = vector.shape_cast %53 : vector<1x10x1024xf32> to vector<10x1024xf32>
    %55 = vector.broadcast %52 : vector<1x1024xf32> to vector<10x1024xf32>
    %56 = arith.mulf %55, %54 : vector<10x1024xf32>
    %57 = arith.addf %51, %56 : vector<10x1024xf32>
    %58 = vector.extract_strided_slice %16 {offsets = [7, 0], sizes = [1, 1024], strides = [1, 1]} : vector<8x1024xf32> to vector<1x1024xf32>
    %c7 = arith.constant 7 : index
    %c0_24 = arith.constant 0 : index
    %c0_25 = arith.constant 0 : index
    %59 = vector.load %arg4[%c7, %c0_24, %c0_25] : memref<8x10x1024xf32, #tpu.memory_space<vmem>>, vector<1x10x1024xf32>
    %60 = vector.shape_cast %59 : vector<1x10x1024xf32> to vector<10x1024xf32>
    %61 = vector.broadcast %58 : vector<1x1024xf32> to vector<10x1024xf32>
    %62 = arith.mulf %61, %60 : vector<10x1024xf32>
    %63 = arith.addf %57, %62 : vector<10x1024xf32>
    %cst_26 = arith.constant dense<0.000000e+00> : vector<10xf32>
    %64 = vector.multi_reduction <add>, %63, %cst_26 [1] : vector<10x1024xf32> to vector<10xf32>
    %65 = vector.shape_cast %64 : vector<10xf32> to vector<10x1xf32>
    %66 = arith.addf %65, %2 : vector<10x1xf32>
    %c0_27 = arith.constant 0 : index
    %c0_28 = arith.constant 0 : index
    %c0_29 = arith.constant 0 : index
    %67 = vector.load %arg6[%c0_27, %c0_28, %c0_29] : memref<1x10x1xf32, #tpu.memory_space<vmem>>, vector<1x10x1xf32>
    %68 = vector.shape_cast %67 : vector<1x10x1xf32> to vector<10x1xf32>
    %69 = vector.shape_cast %66 : vector<10x1xf32> to vector<1x10x1xf32>
    tpu.vector_store %arg6[%c0_27, %c0_28, %c0_29], %69 {strides = array<i32>} : memref<1x10x1xf32, #tpu.memory_space<vmem>>, vector<1x10x1xf32>,
    return
  }
  func.func @transform_0(%arg0: i32) -> (i32, i32, i32) {
    %c0_i32 = arith.constant 0 : i32
    %c0_i32_0 = arith.constant 0 : i32
    %c0_i32_1 = arith.constant 0 : i32
    return %arg0, %c0_i32, %c0_i32_0 : i32, i32, i32
  }
  func.func @transform_1(%arg0: i32) -> (i32, i32) {
    %c0_i32 = arith.constant 0 : i32
    %c0_i32_0 = arith.constant 0 : i32
    %c0_i32_1 = arith.constant 0 : i32
    return %c0_i32, %c0_i32_0 : i32, i32
  }
  func.func @transform_2(%arg0: i32) -> (i32, i32) {
    %c0_i32 = arith.constant 0 : i32
    %c0_i32_0 = arith.constant 0 : i32
    %c0_i32_1 = arith.constant 0 : i32
    return %c0_i32, %c0_i32_0 : i32, i32
  }
  func.func @transform_3(%arg0: i32) -> (i32, i32, i32) {
    %c0_i32 = arith.constant 0 : i32
    %c0_i32_0 = arith.constant 0 : i32
    %c0_i32_1 = arith.constant 0 : i32
    %c0_i32_2 = arith.constant 0 : i32
    return %c0_i32, %c0_i32_0, %c0_i32_1 : i32, i32, i32
  }
  func.func @transform_4(%arg0: i32) -> (i32, i32) {
    %c0_i32 = arith.constant 0 : i32
    %c0_i32_0 = arith.constant 0 : i32
    %c0_i32_1 = arith.constant 0 : i32
    return %c0_i32, %c0_i32_0 : i32, i32
  }
  func.func @transform_5(%arg0: i32) -> (i32, i32, i32) {
    %c0_i32 = arith.constant 0 : i32
    %c0_i32_0 = arith.constant 0 : i32
    %c0_i32_1 = arith.constant 0 : i32
    return %arg0, %c0_i32, %c0_i32_0 : i32, i32, i32
  }
}

</mosaic_0001>

<bundles_post_ra>
// kernel: conv_network_forward.1
= control target key start
LH: loop header
LB: loop body
LE: loop exit
PB: predicated region body
PF: predicated region fallthrough
CT: control target
= control target key end

     0   :  { %s1704_s18 = smov 0   ;;  %s2640_s0 = inlined_call_operand.vmem [shape: f32[2,32,1152], index: 0, kind: input, shape index: {}]   ;;  %s2641_s1 = inlined_call_operand.vmem [shape: f32[8,32], index: 1, kind: input, shape index: {}]   ;;  %s2642_s2 = inlined_call_operand.vmem [shape: f32[8,1], index: 2, kind: input, shape index: {}]   ;;  %s2643_s3 = inlined_call_operand.vmem [shape: f32[8,10,1024], index: 3, kind: input, shape index: {}]   ;;  %s2644_s4 = inlined_call_operand.vmem [shape: f32[10,1], index: 4, kind: input, shape index: {}]   ;;  %s2645_s5 = inlined_call_operand.vmem [shape: f32[2,10,1], index: 5, kind: output, shape index: {}]  }
   0x1 LB: > { %s1462_s19 = sadd.s32 4294967295, %s1666_s18   ;;  %p1466_p0 = scmp.ge.s32.totalorder %s1666_s18, 1  ;;  %s1666_s18 = sphi %s1704_s18, %s15_s18  }
   0x2   : > { %p187_p1 = scmp.lt.s32.totalorder %s1666_s18, 3 }
   0x4   : > { %p188_p2 = pnand %p1466_p0, %p187_p1 }
   0x6   : > { %191 = sbr.rel (%p188_p2) target bundleno = 730 (0x2da), region = 40 }
   0xd   : > { %p215_p3 = scmp.lt.s32.totalorder %s1462_s19, 1  ;;  %v1668_v0 = vmov 0.0   ;;  %v226_v1 = vld [vmem:[%s2642_s2] sm:$0xff]  ;;  %v1669_v2 = vmov 0   ;;  %vm270_vm0 = vcmask 261120   ;;  %v1670_v55 = vmov 0.0|0.0  }
   0xe   : > { %338 = vmatprep.mubr.f32.mxu0 %v1668_v0  ;;  %409 = vmatprep.mubr.f32.mxu1 %v1668_v0  ;;  %v225_v29 = vld [vmem:[%s2641_s1] sm:$0xff]  ;;  %vm1671_vm1 = vmmov 0   ;;  %s1672_s28 = smov 127   ;;  %vm664_vm2 = vcmask 1039360   ;;  %s1673_s29 = smov 96   ;;  %vm718_vm3 = vcmask 785408  }
   0xf   : > { %s2740_s19 = smov (!%p215_p3, %s1462_s19), 1  ;;  %1659 = vset.pattern.permute.xlu0 %v1669_v2  ;;  %vm1383_vm4 = vcmask 1041408   ;;  %vm1403_vm5 = vcmask 7168   ;;  %vm1405_vm6 = vcmask 1024  }
  0x10   : > { %267 = vperm.xlu0 %1659, %v226_v1   ;;  %s1644_s22 = smul.u32 288, %s2740_s19  ;;  %s1589_s8 = sshll.u32 %s2740_s19, 4 }
  0x11   : > { %s224_s13 = scalar_lea.vmem %s2645_s5, %s1589_s8 }
  0x12   : > { %s1723_s25 = scalar_lea.vmem %s2640_s0, %s1644_s22 }
  0x13   : > { %v230_v3 = vld [vmem:[%s1723_s25 + $0x8] sm:$0xff]  ;;  %v239_v4 = vld [vmem:[%s1723_s25 + $0x50] sm:$0xff]  ;;  %v232_v5 = vld [vmem:[%s1723_s25 + $0x18] sm:$0xff] }
  0x14   : > { %v1606_v6 = vpack.c.bf16 %v239_v4, %v230_v3  ;;  %v241_v7 = vld [vmem:[%s1723_s25 + $0x60] sm:$0xff]  ;;  %v238_v9 = vld [vmem:[%s1723_s25 + $0x48] sm:$0xff]  ;;  %v231_v12 = vld [vmem:[%s1723_s25 + $0x10] sm:$0xff] }
  0x15   : > { %v229_v8 = vld [vmem:[%s1723_s25] sm:$0xff]  ;;  %v1614_v10 = vpack.c.bf16 %v241_v7, %v232_v5  ;;  %v240_v13 = vld [vmem:[%s1723_s25 + $0x58] sm:$0xff]  ;;  %v250_v17 = vld [vmem:[%s1723_s25 + $0xa8] sm:$0xff] }
  0x16   : > { %v1608_v11 = vpack.c.bf16 %v238_v9, %v229_v8  ;;  %v248_v14 = vld [vmem:[%s1723_s25 + $0x98] sm:$0xff]  ;;  %1607 = vmatprep.subr.bf16.mxu0 %v1606_v6  ;;  %v1616_v15 = vpack.c.bf16 %v240_v13, %v231_v12  ;;  %v257_v16 = vld [vmem:[%s1723_s25 + $0xe0] sm:$0xff]  ;;  %v259_v18 = vld [vmem:[%s1723_s25 + $0xf0] sm:$0xff] }
  0x17   : > { %1615 = vmatprep.subr.bf16.mxu1 %v1614_v10  ;;  %v1610_v19 = vpack.c.bf16 %v257_v16, %v248_v14  ;;  %v1618_v20 = vpack.c.bf16 %v259_v18, %v250_v17  ;;  %v247_v21 = vld [vmem:[%s1723_s25 + $0x90] sm:$0xff]  ;;  %v256_v22 = vld [vmem:[%s1723_s25 + $0xd8] sm:$0xff]  ;;  %v249_v23 = vld [vmem:[%s1723_s25 + $0xa0] sm:$0xff] }
  0x18   : > { %1609 = vmatpush1.bf16.msra.mxu0 %v1608_v11  ;;  %1617 = vmatpush1.bf16.msra.mxu1 %v1616_v15  ;;  %v1612_v24 = vpack.c.bf16 %v256_v22, %v247_v21  ;;  %v258_v25 = vld [vmem:[%s1723_s25 + $0xe8] sm:$0xff]  ;;  %v243_v27 = vld [vmem:[%s1723_s25 + $0x70] sm:$0xff]  ;;  %v236_v31 = vld [vmem:[%s1723_s25 + $0x38] sm:$0xff] }
  0x19   : > { %v234_v26 = vld [vmem:[%s1723_s25 + $0x28] sm:$0xff]  ;;  %1611 = vmatprep.subr.bf16.mxu0 %v1610_v19  ;;  %1619 = vmatprep.subr.bf16.mxu1 %v1618_v20  ;;  %v1620_v28 = vpack.c.bf16 %v258_v25, %v249_v23  ;;  %v245_v32 = vld [vmem:[%s1723_s25 + $0x80] sm:$0xff]  ;;  %v235_v36 = vld [vmem:[%s1723_s25 + $0x30] sm:$0xff] }
  0x1a   : > { %v1622_v30 = vpack.c.bf16 %v243_v27, %v234_v26  ;;  %v233_v33 = vld [vmem:[%s1723_s25 + $0x20] sm:$0xff]  ;;  %v1630_v34 = vpack.c.bf16 %v245_v32, %v236_v31  ;;  %v242_v35 = vld [vmem:[%s1723_s25 + $0x68] sm:$0xff]  ;;  %v244_v37 = vld [vmem:[%s1723_s25 + $0x78] sm:$0xff] }
  0x1b   : > { %v1624_v38 = vpack.c.bf16 %v242_v35, %v233_v33  ;;  %v252_v39 = vld [vmem:[%s1723_s25 + $0xb8] sm:$0xff]  ;;  %v261_v40 = vld [vmem:[%s1723_s25 + $0x100] sm:$0xff]  ;;  %v254_v41 = vld [vmem:[%s1723_s25 + $0xc8] sm:$0xff]  ;;  %v1632_v42 = vpack.c.bf16 %v244_v37, %v235_v36 }
  0x1c   : > { %1613 = vmatpush1.bf16.msra.mxu0 %v1612_v24  ;;  %1621 = vmatpush1.bf16.msra.mxu1 %v1620_v28  ;;  %v1626_v43 = vpack.c.bf16 %v261_v40, %v252_v39  ;;  %v263_v44 = vld [vmem:[%s1723_s25 + $0x110] sm:$0xff]  ;;  %v260_v46 = vld [vmem:[%s1723_s25 + $0xf8] sm:$0xff]  ;;  %v253_v48 = vld [vmem:[%s1723_s25 + $0xc0] sm:$0xff] }
  0x1d   : > { %1623 = vmatprep.subr.bf16.mxu0 %v1622_v30  ;;  %v251_v45 = vld [vmem:[%s1723_s25 + $0xb0] sm:$0xff]  ;;  %1631 = vmatprep.subr.bf16.mxu1 %v1630_v34  ;;  %v1634_v47 = vpack.c.bf16 %v263_v44, %v254_v41  ;;  %v262_v49 = vld [vmem:[%s1723_s25 + $0x108] sm:$0xff]  ;;  %v237_v52 = vld [vmem:[%s1723_s25 + $0x40] sm:$0xff] }
  0x1e   : > { %v1628_v50 = vpack.c.bf16 %v260_v46, %v251_v45  ;;  %v1636_v51 = vpack.c.bf16 %v262_v49, %v253_v48  ;;  %v246_v53 = vld [vmem:[%s1723_s25 + $0x88] sm:$0xff]  ;;  %v255_v56 = vld [vmem:[%s1723_s25 + $0xd0] sm:$0xff]  ;;  %v264_v57 = vld [vmem:[%s1723_s25 + $0x118] sm:$0xff] }
  0x1f   : > { %1470 = vmatmul.mubr.msk.f32.vlgmr.msra.gmra.mrb[0].mxu0 %vm270_vm0, %v225_v29  ;;  %1471 = vmatmul.mubr.msk.f32.vlgmr.msra.gmra.mrb[0].mxu1 %vm270_vm0, %v225_v29  ;;  %v1639_v54 = vpack.c.bf16 %v246_v53, %v237_v52  ;;  %v1642_v58 = vpack.c.bf16 %v264_v57, %v255_v56 }
  0x20   : > { %1625 = vmatpush1.bf16.msra.mxu0 %v1624_v38  ;;  %1633 = vmatpush1.bf16.msra.mxu1 %v1632_v42 }
  0x21   : > { %1627 = vmatprep.subr.bf16.mxu0 %v1626_v43  ;;  %1635 = vmatprep.subr.bf16.mxu1 %v1634_v47 }
  0x22   : > { %480 = vmatprep.mubr.f32.mxu0 %v1668_v0  ;;  %551 = vmatprep.mubr.f32.mxu1 %v1668_v0 }
  0x24   : > { %1629 = vmatpush1.bf16.msra.mxu0 %v1628_v50  ;;  %1637 = vmatpush1.bf16.msra.mxu1 %v1636_v51  ;;  %v759_v50 = vlaneseq }
  0x25   : > { %1638 = vmatprep.subr.bf16.mxu0 %v1670_v55 }
  0x26   : > { %v760_v51 = vshrl.u32 %v759_v50, 7 }
  0x27   : > { %1472 = vmatmul.mubr.msk.f32.vlgmr.msra.gmra.mrb[2].mxu0 %vm270_vm0, %v225_v29  ;;  %1473 = vmatmul.mubr.msk.f32.vlgmr.msra.gmra.mrb[2].mxu1 %vm270_vm0, %v225_v29 }
  0x28   : > { %1640 = vmatpush3.bf16.msra.mxu0 %v1639_v54  ;;  %1603 = vmatprep.mubr.msk.f32.mxu0 %vm1671_vm1, %v1668_v0  ;;  %v1792_v54 = vsub.s32 0, %v760_v51  ;;  %v1797_v57 = vsub.s32 2, %v760_v51 }
  0x29   : > { %1641 = vmatprep.subr.bf16.mxu0 %v1670_v55  ;;  %v1794_v55 = vsub.s32 1, %v760_v51 }
  0x2c   : > { %1643 = vmatpush3.bf16.msra.mxu0 %v1642_v58  ;;  %v1799_v58 = vsub.s32 3, %v760_v51 }
  0x2f   : > { %1604 = vmatmul.mubr.msk.f32.vlgmr.msra.gmra.mrb[4].mxu0 %vm270_vm0, %v225_v29 }
  0x8f   : > { %v268_v59 = vpop.permute.xlu0 %267 }
  0xf2   : > { %v340_v60 = vpop.f32.mrb[0].mxu0  ;;  %v411_v62 = vpop.f32.mrb[0].mxu1 }
  0xf3   : > { %v341_v61 = vadd.f32 %v340_v60, %v268_v59  ;;  %v342_v63 = vpop.f32.mrb[1].mxu0  ;;  %v412_v1 = vadd.f32 %v411_v62, %v268_v59  ;;  %v413_v2 = vpop.f32.mrb[1].mxu1  ;;  %v1803_v60 = vsub.s32 4, %v760_v51 }
  0xf4   : > { %v414_v4 = vadd.f32 %v413_v2, %v268_v59  ;;  %v343_v6 = vadd.f32 %v342_v63, %v268_v59 }
  0xf5   : > { %v628_v3 = vmax.f32 %v341_v61, 0.0  ;;  %v630_v5 = vmax.f32 %v412_v1, 0.0  ;;  %v1805_v61 = vsub.s32 5, %v760_v51 }
  0xf6   : > { %v631_v7 = vmax.f32 %v414_v4, 0.0  ;;  %v629_v8 = vmax.f32 %v343_v6, 0.0  ;;  %v1475_v6 = vld [vmem:[%s2643_s3 + $0x80] sm:$0xff] }
  0xf7   : > { %646 = vrot.lane.b32.xlu0 %v628_v3, %s1672_s28  ;;  %650 = vrot.lane.b32.xlu1 %v630_v5, %s1672_s28 }
  0xfa   : > { %v482_v0 = vpop.f32.mrb[2].mxu0  ;;  %v553_v10 = vpop.f32.mrb[2].mxu1 }
  0xfb   : > { %v483_v9 = vadd.f32 %v482_v0, %v268_v59  ;;  %v484_v11 = vpop.f32.mrb[3].mxu0  ;;  %652 = vrot.lane.b32.xlu0 %v631_v7, %s1672_s28  ;;  %v555_v13 = vpop.f32.mrb[3].mxu1  ;;  %648 = vrot.lane.b32.xlu1 %v629_v8, %s1672_s28  ;;  %v554_v15 = vadd.f32 %v553_v10, %v268_v59  ;;  %v1491_v10 = vld [vmem:[%s2643_s3 + $0x100] sm:$0xff] }
  0xfc   : > { %v485_v12 = vadd.f32 %v484_v11, %v268_v59  ;;  %v556_v17 = vadd.f32 %v555_v13, %v268_v59  ;;  %v1507_v11 = vld [vmem:[%s2643_s3 + $0x180] sm:$0xff] }
  0xfd   : > { %v632_v14 = vmax.f32 %v483_v9, 0.0  ;;  %v634_v18 = vmax.f32 %v554_v15, 0.0 }
  0xfe   : > { %v633_v16 = vmax.f32 %v485_v12, 0.0  ;;  %v635_v19 = vmax.f32 %v556_v17, 0.0 }
  0xff   : > { %654 = vrot.lane.b32.xlu1 %v632_v14, %s1672_s28 }
 0x100   : > { %656 = vrot.lane.b32.xlu0 %v633_v16, %s1672_s28 }
 0x102   : > { %v624_v20 = vpop.f32.mrb[4].mxu0 }
 0x103   : > { %v625_v21 = vadd.f32 %v624_v20, %v268_v59  ;;  %v1605_v22 = vpop.f32.mrb[5].mxu0  ;;  %658 = vrot.lane.b32.xlu1 %v634_v18, %s1672_s28  ;;  %v1523_v20 = vld [vmem:[%s2643_s3 + $0x200] sm:$0xff] }
 0x104   : > { %660 = vrot.lane.b32.xlu0 %v635_v19, %s1672_s28  ;;  %v1863_v22 = vsub.s32 7, %v760_v51 }
 0x105   : > { %v636_v23 = vmax.f32 %v625_v21, 0.0  ;;  %v1539_v21 = vld [vmem:[%s2643_s3 + $0x280] sm:$0xff] }
 0x107   : > { %662 = vrot.lane.b32.xlu1 %v636_v23, %s1672_s28 }
 0x169   : > { %v647_v24 = vpop.permute.xlu0 %646  ;;  %v651_v25 = vpop.permute.xlu1 %650 }
 0x16d   : > { %v653_v26 = vpop.permute.xlu0 %652  ;;  %v649_v27 = vpop.permute.xlu1 %648 }
 0x16e   : > { %v665_v28 = vsel %vm664_vm2, %v647_v24, %v649_v27  ;;  %v666_v29 = vsel %vm664_vm2, %v649_v27, %v651_v25  ;;  %v667_v32 = vsel %vm664_vm2, %v651_v25, %v653_v26  ;;  %v744_v25 = vld [vmem:[%s2643_s3 + $0x8] sm:$0xff] }
 0x16f   : > { %v681_v30 = vmax.f32 %v628_v3, %v665_v28  ;;  %v682_v31 = vmax.f32 %v629_v8, %v666_v29  ;;  %v683_v36 = vmax.f32 %v630_v5, %v667_v32  ;;  %v743_v5 = vld [vmem:[%s2643_s3] sm:$0xff]  ;;  %v745_v32 = vld [vmem:[%s2643_s3 + $0x10] sm:$0xff] }
 0x171   : > { %702 = vrot.lane.b32.xlu1 %v682_v31, %s1673_s29  ;;  %v655_v33 = vpop.permute.xlu1 %654  ;;  %700 = vrot.lane.b32.xlu0 %v681_v30, %s1673_s29 }
 0x172   : > { %v657_v34 = vpop.permute.xlu0 %656  ;;  %v668_v35 = vsel %vm664_vm2, %v653_v26, %v655_v33 }
 0x173   : > { %v1776_v37 = vmax.f32 %v631_v7, %v668_v35  ;;  %v669_v38 = vsel %vm664_vm2, %v655_v33, %v657_v34  ;;  %v1476_v33 = vld [vmem:[%s2643_s3 + $0x88] sm:$0xff] }
 0x174   : > { %v685_v42 = vmax.f32 %v632_v14, %v669_v38  ;;  %v1849_v14 = vsub.s32 6, %v760_v51 }
 0x175   : > { %v659_v39 = vpop.permute.xlu1 %658  ;;  %706 = vrot.lane.b32.xlu1 %v1776_v37, %s1673_s29  ;;  %704 = vrot.lane.b32.xlu0 %v683_v36, %s1673_s29 }
 0x176   : > { %v661_v40 = vpop.permute.xlu0 %660  ;;  %v670_v41 = vsel %vm664_vm2, %v657_v34, %v659_v39 }
 0x177   : > { %v1781_v43 = vmax.f32 %v633_v16, %v670_v41  ;;  %v671_v44 = vsel %vm664_vm2, %v659_v39, %v661_v40 }
 0x178   : > { %v1786_v47 = vmax.f32 %v634_v18, %v671_v44 }
 0x179   : > { %v663_v45 = vpop.permute.xlu1 %662  ;;  %710 = vrot.lane.b32.xlu1 %v1781_v43, %s1673_s29  ;;  %708 = vrot.lane.b32.xlu0 %v685_v42, %s1673_s29 }
 0x17a   : > { %v672_v46 = vsel %vm664_vm2, %v661_v40, %v663_v45  ;;  %v690_v49 = vmax.f32 %v636_v23, %v663_v45  ;;  %v746_v40 = vld [vmem:[%s2643_s3 + $0x18] sm:$0xff]  ;;  %v1477_v45 = vld [vmem:[%s2643_s3 + $0x90] sm:$0xff] }
 0x17b   : > { %v1788_v48 = vmax.f32 %v635_v19, %v672_v46 }
 0x17d   : > { %714 = vrot.lane.b32.xlu1 %v1788_v48, %s1673_s29  ;;  %712 = vrot.lane.b32.xlu0 %v1786_v47, %s1673_s29 }
 0x181   : > { %716 = vrot.lane.b32.xlu0 %v690_v49, %s1673_s29  ;;  %v1492_v49 = vld [vmem:[%s2643_s3 + $0x108] sm:$0xff] }
 0x1e3   : > { %v703_v52 = vpop.permute.xlu1 %702  ;;  %v701_v53 = vpop.permute.xlu0 %700 }
 0x1e4   : > { %v719_v56 = vsel %vm718_vm3, %v701_v53, %v703_v52 }
 0x1e5   : > { %v1801_v59 = vmax.f32 %v681_v30, %v719_v56 }
 0x1e7   : > { %v707_v62 = vpop.permute.xlu1 %706  ;;  %v705_v63 = vpop.permute.xlu0 %704  ;;  %v1809_v1 = vrot.slane %v1801_v59, %v1792_v54  ;;  %v1813_v2 = vrot.slane %v1801_v59, %v1794_v55  ;;  %v1825_v7 = vrot.slane %v1801_v59, %v1797_v57  ;;  %v1829_v8 = vrot.slane %v1801_v59, %v1799_v58 }
 0x1e8   : > { %v720_v3 = vsel %vm718_vm3, %v703_v52, %v705_v63  ;;  %v721_v4 = vsel %vm718_vm3, %v705_v63, %v707_v62  ;;  %v1843_v12 = vrot.slane %v1801_v59, %v1803_v60  ;;  %v1847_v13 = vrot.slane %v1801_v59, %v1805_v61  ;;  %v747_v63 = vld [vmem:[%s2643_s3 + $0x20] sm:$0xff] }
 0x1e9   : > { %2677 = vst [vmem:[#allocation2_spill] sm:$0xff] %v1825_v7  ;;  %2678 = vst [vmem:[#allocation3_spill] sm:$0xff] %v1829_v8  ;;  %v1831_v0 = vmax.f32 %v682_v31, %v720_v3  ;;  %v1833_v9 = vmax.f32 %v683_v36, %v721_v4  ;;  %v791_v18 = vmul.f32 %v1809_v1, %v743_v5  ;;  %v1478_v4 = vld [vmem:[%s2643_s3 + $0x98] sm:$0xff]  ;;  %v1479_v5 = vld [vmem:[%s2643_s3 + $0xa0] sm:$0xff] }
 0x1ea   : > { %2679 = vst [vmem:[#allocation4_spill] sm:$0xff] %v1843_v12  ;;  %2680 = vst [vmem:[#allocation5_spill] sm:$0xff] %v1847_v13  ;;  %v856_v19 = vmul.f32 %v1475_v6, %v1813_v2  ;;  %v1871_v26 = vmul.f32 %v1491_v10, %v1825_v7  ;;  %v1874_v27 = vmul.f32 %v1507_v11, %v1829_v8 }
 0x1eb   : > { %v711_v15 = vpop.permute.xlu1 %710  ;;  %v709_v16 = vpop.permute.xlu0 %708  ;;  %v1853_v17 = vrot.slane %v1831_v0, %v1792_v54  ;;  %v1883_v30 = vrot.slane %v1833_v9, %v1792_v54  ;;  %v1887_v31 = vrot.slane %v1831_v0, %v1794_v55  ;;  %v1897_v34 = vrot.slane %v1833_v9, %v1794_v55 }
 0x1ec   : > { %v722_v23 = vsel %vm718_vm3, %v707_v62, %v709_v16  ;;  %v723_v24 = vsel %vm718_vm3, %v709_v16, %v711_v15  ;;  %v1901_v35 = vrot.slane %v1831_v0, %v1797_v57  ;;  %v1904_v36 = vmul.f32 %v1523_v20, %v1843_v12 }
 0x1ed   : > { %v1877_v28 = vmax.f32 %v1776_v37, %v722_v23  ;;  %v1879_v29 = vmax.f32 %v685_v42, %v723_v24  ;;  %v1907_v37 = vmul.f32 %v1539_v21, %v1847_v13  ;;  %v792_v44 = vmul.f32 %v1853_v17, %v744_v25  ;;  %v1480_v21 = vld [vmem:[%s2643_s3 + $0xa8] sm:$0xff]  ;;  %v1481_v23 = vld [vmem:[%s2643_s3 + $0xb0] sm:$0xff]  ;;  %v1494_v13 = vld [vmem:[%s2643_s3 + $0x118] sm:$0xff] }
 0x1ee   : > { %2681 = vst [vmem:[#allocation6_spill] sm:$0xff] %v1901_v35  ;;  %v1924_v46 = vadd.f32 %v856_v19, %v791_v18  ;;  %v793_v3 = vmul.f32 %v1883_v30, %v745_v32  ;;  %v858_v10 = vmul.f32 %v1477_v45, %v1897_v34  ;;  %v1963_v11 = vrot.slane %v1833_v9, %v1797_v57  ;;  %v749_v18 = vld [vmem:[%s2643_s3 + $0x30] sm:$0xff] }
 0x1ef   : > { %v715_v38 = vpop.permute.xlu1 %714  ;;  %v713_v39 = vpop.permute.xlu0 %712  ;;  %v1914_v41 = vrot.slane %v1877_v28, %v1792_v54  ;;  %v1918_v42 = vrot.slane %v1879_v29, %v1792_v54  ;;  %v1933_v52 = vrot.slane %v1877_v28, %v1794_v55  ;;  %v1937_v53 = vrot.slane %v1879_v29, %v1794_v55 }
 0x1f0   : > { %v724_v50 = vsel %vm718_vm3, %v711_v15, %v713_v39  ;;  %v725_v51 = vsel %vm718_vm3, %v713_v39, %v715_v38  ;;  %2683 = vst [vmem:[#allocation8_spill] sm:$0xff] %v1963_v11  ;;  %v938_v15 = vmul.f32 %v1492_v49, %v1901_v35  ;;  %v1493_v49 = vld [vmem:[%s2643_s3 + $0x110] sm:$0xff]  ;;  %v874_v35 = vadd.f32 %v858_v10, %v793_v3 }
 0x1f1   : > { %2682 = vst [vmem:[#allocation7_spill] sm:$0xff] %v1937_v53  ;;  %v1940_v56 = vmax.f32 %v1781_v43, %v724_v50  ;;  %v1943_v62 = vmax.f32 %v1786_v47, %v725_v51  ;;  %v857_v43 = vmul.f32 %v1476_v33, %v1887_v31  ;;  %v748_v47 = vld [vmem:[%s2643_s3 + $0x28] sm:$0xff]  ;;  %v794_v6 = vmul.f32 %v1914_v41, %v746_v40 }
 0x1f2   : > { %v795_v33 = vmul.f32 %v1918_v42, %v747_v63  ;;  %v859_v39 = vmul.f32 %v1478_v4, %v1933_v52  ;;  %v860_v40 = vmul.f32 %v1479_v5, %v1937_v53  ;;  %v2003_v50 = vrot.slane %v1877_v28, %v1797_v57  ;;  %v1482_v5 = vld [vmem:[%s2643_s3 + $0xb8] sm:$0xff] }
 0x1f3   : > { %v717_v16 = vpop.permute.xlu0 %716  ;;  %v1971_v19 = vrot.slane %v1940_v56, %v1792_v54  ;;  %v1975_v20 = vrot.slane %v1943_v62, %v1792_v54  ;;  %v1985_v24 = vrot.slane %v1940_v56, %v1794_v55  ;;  %v1989_v25 = vrot.slane %v1943_v62, %v1794_v55 }
 0x1f4   : > { %v726_v32 = vsel %vm718_vm3, %v715_v38, %v717_v16  ;;  %2688 = vst [vmem:[#allocation13_spill] sm:$0xff] %v2003_v50  ;;  %v2007_v38 = vrot.slane %v1879_v29, %v1797_v57  ;;  %v2011_v51 = vrot.slane %v1940_v56, %v1797_v57  ;;  %v873_v8 = vadd.f32 %v857_v43, %v792_v44 }
 0x1f5   : > { %2684 = vst [vmem:[#allocation9_spill] sm:$0xff] %v1971_v19  ;;  %2685 = vst [vmem:[#allocation10_spill] sm:$0xff] %v1975_v20  ;;  %v1996_v45 = vmax.f32 %v1788_v48, %v726_v32  ;;  %v750_v48 = vld [vmem:[%s2643_s3 + $0x38] sm:$0xff]  ;;  %v796_v63 = vmul.f32 %v1971_v19, %v748_v47  ;;  %v797_v4 = vmul.f32 %v1975_v20, %v749_v18  ;;  %v1495_v18 = vld [vmem:[%s2643_s3 + $0x120] sm:$0xff] }
 0x1f6   : > { %2686 = vst [vmem:[#allocation11_spill] sm:$0xff] %v1985_v24  ;;  %2687 = vst [vmem:[#allocation12_spill] sm:$0xff] %v1989_v25  ;;  %v861_v16 = vmul.f32 %v1480_v21, %v1985_v24  ;;  %v862_v32 = vmul.f32 %v1481_v23, %v1989_v25  ;;  %v1496_v21 = vld [vmem:[%s2643_s3 + $0x128] sm:$0xff]  ;;  %v2042_v23 = vrot.slane %v1943_v62, %v1797_v57  ;;  %v1497_v25 = vld [vmem:[%s2643_s3 + $0x130] sm:$0xff] }
 0x1f7   : > { %2689 = vst [vmem:[#allocation14_spill] sm:$0xff] %v2007_v38  ;;  %2690 = vst [vmem:[#allocation15_spill] sm:$0xff] %v2011_v51  ;;  %v2028_v12 = vrot.slane %v1996_v45, %v1792_v54  ;;  %v2032_v47 = vrot.slane %v1996_v45, %v1794_v55  ;;  %v2046_v54 = vrot.slane %v1996_v45, %v1797_v57  ;;  %v1498_v20 = vld [vmem:[%s2643_s3 + $0x138] sm:$0xff] }
 0x1f8   : > { %2692 = vst [vmem:[#allocation17_spill] sm:$0xff] %v2042_v23  ;;  %v875_v55 = vadd.f32 %v859_v39, %v794_v6  ;;  %v876_v7 = vadd.f32 %v860_v40, %v795_v33  ;;  %v939_v19 = vmul.f32 %v1493_v49, %v1963_v11  ;;  %v940_v57 = vmul.f32 %v1494_v13, %v2003_v50  ;;  %v1508_v49 = vld [vmem:[%s2643_s3 + $0x188] sm:$0xff]  ;;  %v1509_v13 = vld [vmem:[%s2643_s3 + $0x190] sm:$0xff] }
 0x1f9   : > { %2691 = vst [vmem:[#allocation16_spill] sm:$0xff] %v2032_v47  ;;  %2693 = vst [vmem:[#allocation18_spill] sm:$0xff] %v2046_v54  ;;  %v798_v24 = vmul.f32 %v2028_v12, %v750_v48  ;;  %v863_v53 = vmul.f32 %v1482_v5, %v2032_v47  ;;  %v877_v44 = vadd.f32 %v861_v16, %v796_v63  ;;  %v1511_v5 = vld [vmem:[%s2643_s3 + $0x1a0] sm:$0xff]  ;;  %v1512_v16 = vld [vmem:[%s2643_s3 + $0x1a8] sm:$0xff] }
 0x1fa   : > { %v878_v3 = vadd.f32 %v862_v32, %v797_v4  ;;  %v941_v43 = vmul.f32 %v1495_v18, %v2007_v38  ;;  %v942_v6 = vmul.f32 %v1496_v21, %v2011_v51  ;;  %v943_v33 = vmul.f32 %v1497_v25, %v2042_v23  ;;  %v1513_v32 = vld [vmem:[%s2643_s3 + $0x1b0] sm:$0xff] }
 0x1fb   : > { %v879_v10 = vadd.f32 %v863_v53, %v798_v24  ;;  %v944_v39 = vmul.f32 %v1498_v20, %v2046_v54  ;;  %v2064_v40 = vrot.slane %v1831_v0, %v1799_v58  ;;  %v1510_v53 = vld [vmem:[%s2643_s3 + $0x198] sm:$0xff]  ;;  %v2077_v24 = vrot.slane %v1833_v9, %v1799_v58 }
 0x1fc   : > { %v2081_v20 = vrot.slane %v1877_v28, %v1799_v58  ;;  %v2085_v25 = vrot.slane %v1879_v29, %v1799_v58  ;;  %v2089_v48 = vrot.slane %v1940_v56, %v1799_v58  ;;  %v953_v63 = vadd.f32 %v1871_v26, %v1924_v46  ;;  %v1514_v54 = vld [vmem:[%s2643_s3 + $0x1b8] sm:$0xff] }
 0x1fd   : > { %v954_v4 = vadd.f32 %v938_v15, %v873_v8  ;;  %v2104_v18 = vrot.slane %v1943_v62, %v1799_v58  ;;  %v2108_v26 = vrot.slane %v1996_v45, %v1799_v58  ;;  %v955_v8 = vadd.f32 %v939_v19, %v874_v35 }
 0x1fe   : > { %v956_v46 = vadd.f32 %v940_v57, %v875_v55  ;;  %v957_v15 = vadd.f32 %v941_v43, %v876_v7  ;;  %v958_v21 = vadd.f32 %v942_v6, %v877_v44  ;;  %v959_v23 = vadd.f32 %v943_v33, %v878_v3  ;;  %v1524_v44 = vld [vmem:[%s2643_s3 + $0x208] sm:$0xff]  ;;  %v1525_v3 = vld [vmem:[%s2643_s3 + $0x210] sm:$0xff] }
 0x1ff   : > { %2694 = vst [vmem:[#allocation19_spill] sm:$0xff] %v2104_v18  ;;  %2695 = vst [vmem:[#allocation20_spill] sm:$0xff] %v2108_v26  ;;  %v960_v51 = vadd.f32 %v944_v39, %v879_v10  ;;  %v1019_v38 = vmul.f32 %v1508_v49, %v2064_v40  ;;  %v1020_v50 = vmul.f32 %v1509_v13, %v2077_v24  ;;  %v1527_v13 = vld [vmem:[%s2643_s3 + $0x220] sm:$0xff] }
 0x200   : > { %v1021_v47 = vmul.f32 %v1510_v53, %v2081_v20  ;;  %v1022_v11 = vmul.f32 %v1511_v5, %v2085_v25  ;;  %v1023_v58 = vmul.f32 %v1512_v16, %v2089_v48  ;;  %v1024_v35 = vmul.f32 %v1513_v32, %v2104_v18  ;;  %v1528_v53 = vld [vmem:[%s2643_s3 + $0x228] sm:$0xff] }
 0x201   : > { %v1025_v7 = vmul.f32 %v1514_v54, %v2108_v26  ;;  %v1034_v19 = vadd.f32 %v1874_v27, %v953_v63  ;;  %v2123_v55 = vrot.slane %v1831_v0, %v1803_v60  ;;  %v2127_v57 = vrot.slane %v1833_v9, %v1803_v60  ;;  %v1526_v27 = vld [vmem:[%s2643_s3 + $0x218] sm:$0xff]  ;;  %v1529_v63 = vld [vmem:[%s2643_s3 + $0x230] sm:$0xff] }
 0x202   : > { %v2140_v54 = vrot.slane %v1877_v28, %v1803_v60  ;;  %v2144_v43 = vrot.slane %v1879_v29, %v1803_v60  ;;  %v2148_v6 = vrot.slane %v1940_v56, %v1803_v60  ;;  %v2152_v10 = vrot.slane %v1943_v62, %v1803_v60 }
 0x203   : > { %2696 = vst [vmem:[#allocation21_spill] sm:$0xff] %v2127_v57  ;;  %v1035_v33 = vadd.f32 %v1019_v38, %v954_v4  ;;  %v1036_v39 = vadd.f32 %v1020_v50, %v955_v8  ;;  %v1037_v49 = vadd.f32 %v1021_v47, %v956_v46  ;;  %v2165_v5 = vrot.slane %v1996_v45, %v1803_v60  ;;  %v1530_v4 = vld [vmem:[%s2643_s3 + $0x238] sm:$0xff] }
 0x204   : > { %2697 = vst [vmem:[#allocation22_spill] sm:$0xff] %v2140_v54  ;;  %2698 = vst [vmem:[#allocation23_spill] sm:$0xff] %v2144_v43  ;;  %v1038_v16 = vadd.f32 %v1022_v11, %v957_v15  ;;  %v1039_v38 = vadd.f32 %v1023_v58, %v958_v21  ;;  %v1040_v50 = vadd.f32 %v1024_v35, %v959_v23  ;;  %v1540_v15 = vld [vmem:[%s2643_s3 + $0x288] sm:$0xff] }
 0x205   : > { %2699 = vst [vmem:[#allocation24_spill] sm:$0xff] %v2148_v6  ;;  %2700 = vst [vmem:[#allocation25_spill] sm:$0xff] %v2152_v10  ;;  %v1041_v47 = vadd.f32 %v1025_v7, %v960_v51  ;;  %v1100_v32 = vmul.f32 %v1524_v44, %v2123_v55  ;;  %v1101_v8 = vmul.f32 %v1525_v3, %v2127_v57  ;;  %v1543_v44 = vld [vmem:[%s2643_s3 + $0x2a0] sm:$0xff]  ;;  %v1544_v3 = vld [vmem:[%s2643_s3 + $0x2a8] sm:$0xff] }
 0x206   : > { %2701 = vst [vmem:[#allocation26_spill] sm:$0xff] %v2165_v5  ;;  %v1102_v46 = vmul.f32 %v1526_v27, %v2140_v54  ;;  %v1115_v26 = vadd.f32 %v1904_v36, %v1034_v19  ;;  %v1103_v18 = vmul.f32 %v1527_v13, %v2144_v43  ;;  %v1104_v60 = vmul.f32 %v1528_v53, %v2148_v6  ;;  %v1541_v36 = vld [vmem:[%s2643_s3 + $0x290] sm:$0xff]  ;;  %v1542_v19 = vld [vmem:[%s2643_s3 + $0x298] sm:$0xff] }
 0x207   : > { %v1105_v11 = vmul.f32 %v1529_v63, %v2152_v10  ;;  %v2179_v51 = vrot.slane %v1831_v0, %v1805_v61  ;;  %v1106_v23 = vmul.f32 %v1530_v4, %v2165_v5  ;;  %v2190_v21 = vrot.slane %v1833_v9, %v1805_v61  ;;  %v1545_v5 = vld [vmem:[%s2643_s3 + $0x2b0] sm:$0xff]  ;;  %v1546_v10 = vld [vmem:[%s2643_s3 + $0x2b8] sm:$0xff] }
 0x208   : > { %v2194_v58 = vrot.slane %v1877_v28, %v1805_v61  ;;  %v2198_v35 = vrot.slane %v1879_v29, %v1805_v61  ;;  %v1116_v7 = vadd.f32 %v1100_v32, %v1035_v33  ;;  %v2211_v27 = vrot.slane %v1940_v56, %v1805_v61 }
 0x209   : > { %2702 = vst [vmem:[#allocation27_spill] sm:$0xff] %v2190_v21  ;;  %v2215_v13 = vrot.slane %v1943_v62, %v1805_v61  ;;  %v2219_v33 = vrot.slane %v1996_v45, %v1805_v61  ;;  %v1117_v53 = vadd.f32 %v1101_v8, %v1036_v39  ;;  %v1118_v63 = vadd.f32 %v1102_v46, %v1037_v49 }
 0x20a   : > { %2703 = vst [vmem:[#allocation28_spill] sm:$0xff] %v2194_v58  ;;  %2704 = vst [vmem:[#allocation29_spill] sm:$0xff] %v2198_v35  ;;  %v1119_v4 = vadd.f32 %v1103_v18, %v1038_v16  ;;  %v1120_v32 = vadd.f32 %v1104_v60, %v1039_v38  ;;  %v1121_v6 = vadd.f32 %v1105_v11, %v1040_v50  ;;  %v1555_v50 = vld [vmem:[%s2643_s3 + $0x300] sm:$0xff] }
 0x20b   : > { %2705 = vst [vmem:[#allocation30_spill] sm:$0xff] %v2211_v27  ;;  %2706 = vst [vmem:[#allocation31_spill] sm:$0xff] %v2215_v13  ;;  %v1122_v43 = vadd.f32 %v1106_v23, %v1041_v47  ;;  %v1181_v54 = vmul.f32 %v1540_v15, %v2179_v51  ;;  %v1182_v57 = vmul.f32 %v1541_v36, %v2190_v21 }
 0x20c   : > { %2707 = vst [vmem:[#allocation32_spill] sm:$0xff] %v2219_v33  ;;  %v1183_v61 = vmul.f32 %v1542_v19, %v2194_v58  ;;  %v1184_v39 = vmul.f32 %v1543_v44, %v2198_v35  ;;  %v1185_v18 = vmul.f32 %v1544_v3, %v2211_v27  ;;  %v1196_v49 = vadd.f32 %v1907_v37, %v1115_v26  ;;  %v1556_v37 = vld [vmem:[%s2643_s3 + $0x308] sm:$0xff]  ;;  %v1557_v26 = vld [vmem:[%s2643_s3 + $0x310] sm:$0xff]  ;;  %v1559_v19 = vld [vmem:[%s2643_s3 + $0x320] sm:$0xff] }
 0x20d   : > { %v1186_v16 = vmul.f32 %v1545_v5, %v2215_v13  ;;  %v1187_v38 = vmul.f32 %v1546_v10, %v2219_v33  ;;  %v2240_v47 = vrot.slane %v1801_v59, %v1849_v14  ;;  %v2244_v8 = vrot.slane %v1831_v0, %v1849_v14  ;;  %v1558_v10 = vld [vmem:[%s2643_s3 + $0x318] sm:$0xff]  ;;  %v1560_v44 = vld [vmem:[%s2643_s3 + $0x328] sm:$0xff]  ;;  %v1561_v3 = vld [vmem:[%s2643_s3 + $0x330] sm:$0xff] }
 0x20e   : > { %v2257_v5 = vrot.slane %v1833_v9, %v1849_v14  ;;  %v2261_v46 = vrot.slane %v1877_v28, %v1849_v14  ;;  %v2265_v60 = vrot.slane %v1879_v29, %v1849_v14  ;;  %v2269_v11 = vrot.slane %v1940_v56, %v1849_v14 }
 0x20f   : > { %v1197_v23 = vadd.f32 %v1181_v54, %v1116_v7  ;;  %v1198_v15 = vadd.f32 %v1182_v57, %v1117_v53  ;;  %v1199_v36 = vadd.f32 %v1183_v61, %v1118_v63  ;;  %v2282_v33 = vrot.slane %v1943_v62, %v1849_v14 }
 0x210   : > { %v1200_v13 = vadd.f32 %v1184_v39, %v1119_v4  ;;  %v1201_v54 = vadd.f32 %v1185_v18, %v1120_v32  ;;  %v1202_v57 = vadd.f32 %v1186_v16, %v1121_v6  ;;  %v1203_v7 = vadd.f32 %v1187_v38, %v1122_v43  ;;  %v1571_v43 = vld [vmem:[%s2643_s3 + $0x380] sm:$0xff]  ;;  %v1562_v6 = vld [vmem:[%s2643_s3 + $0x338] sm:$0xff] }
 0x211   : > { %v2286_v53 = vrot.slane %v1996_v45, %v1849_v14  ;;  %v1261_v63 = vmul.f32 %v1555_v50, %v2240_v47  ;;  %v1262_v61 = vmul.f32 %v1556_v37, %v2244_v8  ;;  %v1263_v27 = vmul.f32 %v1557_v26, %v2257_v5  ;;  %v1572_v14 = vld [vmem:[%s2643_s3 + $0x388] sm:$0xff]  ;;  %v1573_v50 = vld [vmem:[%s2643_s3 + $0x390] sm:$0xff]  ;;  %v1574_v37 = vld [vmem:[%s2643_s3 + $0x398] sm:$0xff] }
 0x212   : > { %v1264_v35 = vmul.f32 %v1558_v10, %v2261_v46  ;;  %v1265_v58 = vmul.f32 %v1559_v19, %v2265_v60  ;;  %v1266_v21 = vmul.f32 %v1560_v44, %v2269_v11  ;;  %v1267_v4 = vmul.f32 %v1561_v3, %v2282_v33  ;;  %v1575_v26 = vld [vmem:[%s2643_s3 + $0x3a0] sm:$0xff] }
 0x213   : > { %v1277_v32 = vadd.f32 %v1261_v63, %v1196_v49  ;;  %v1278_v39 = vadd.f32 %v1262_v61, %v1197_v23  ;;  %v2306_v18 = vrot.slane %v1801_v59, %v1863_v22  ;;  %v2310_v16 = vrot.slane %v1831_v0, %v1863_v22  ;;  %v751_v63 = vld [vmem:[%s2643_s3 + $0x40] sm:$0x3] }
 0x214   : > { %v1279_v38 = vadd.f32 %v1263_v27, %v1198_v15  ;;  %v2320_v49 = vrot.slane %v1833_v9, %v1863_v22  ;;  %v2324_v59 = vrot.slane %v1877_v28, %v1863_v22  ;;  %v2328_v0 = vrot.slane %v1879_v29, %v1863_v22  ;;  %v1576_v29 = vld [vmem:[%s2643_s3 + $0x3a8] sm:$0xff] }
 0x215   : > { %v1280_v27 = vadd.f32 %v1264_v35, %v1199_v36  ;;  %v2335_v10 = vrot.slane %v1940_v56, %v1863_v22  ;;  %v1342_v9 = vmul.f32 %v1571_v43, %v2306_v18  ;;  %v1343_v23 = vmul.f32 %v1572_v14, %v2310_v16  ;;  %v1577_v35 = vld [vmem:[%s2643_s3 + $0x3b0] sm:$0xff] }
 0x216   : > { %v1268_v28 = vmul.f32 %v1562_v6, %v2286_v53  ;;  %v1281_v15 = vadd.f32 %v1265_v58, %v1200_v13  ;;  %v2348_v36 = vrot.slane %v1943_v62, %v1863_v22  ;;  %v2352_v56 = vrot.slane %v1996_v45, %v1863_v22  ;;  %v1578_v58 = vld [vmem:[%s2643_s3 + $0x3b8] sm:$0xff]  ;;  %v752_v62 = vld [vmem:[%s2643_s3 + $0x48] sm:$0x3]  ;;  %v753_v14 = vld [vmem:[%s2643_s3 + $0x50] sm:$0x3] }
 0x217   : > { %v1344_v13 = vmul.f32 %v1573_v50, %v2320_v49  ;;  %v1345_v19 = vmul.f32 %v1574_v37, %v2324_v59  ;;  %v1358_v44 = vadd.f32 %v1342_v9, %v1277_v32  ;;  %v1359_v3 = vadd.f32 %v1343_v23, %v1278_v39  ;;  %v754_v6 = vld [vmem:[%s2643_s3 + $0x58] sm:$0x3]  ;;  %v1483_v32 = vld [vmem:[%s2643_s3 + $0xc0] sm:$0x3] }
 0x218   : > { %v1282_v22 = vadd.f32 %v1266_v21, %v1201_v54  ;;  %v1283_v45 = vadd.f32 %v1267_v4, %v1202_v57  ;;  %v1284_v61 = vadd.f32 %v1268_v28, %v1203_v7  ;;  %v1346_v43 = vmul.f32 %v1575_v26, %v2328_v0  ;;  %v1484_v57 = vld [vmem:[%s2643_s3 + $0xc8] sm:$0x3]  ;;  %v1485_v7 = vld [vmem:[%s2643_s3 + $0xd0] sm:$0x3]  ;;  %v1486_v4 = vld [vmem:[%s2643_s3 + $0xd8] sm:$0x3] }
 0x219   : > { %v1347_v39 = vmul.f32 %v1576_v29, %v2335_v10  ;;  %v1360_v50 = vadd.f32 %v1344_v13, %v1279_v38  ;;  %v1361_v21 = vadd.f32 %v1345_v19, %v1280_v27  ;;  %v1374_v54 = vadd.f32 %v1359_v3, %v1358_v44  ;;  %v755_v38 = vld [vmem:[%s2643_s3 + $0x60] sm:$0x3]  ;;  %v756_v28 = vld [vmem:[%s2643_s3 + $0x68] sm:$0x3] }
 0x21a   : > { %v1348_v37 = vmul.f32 %v1577_v35, %v2348_v36  ;;  %v1349_v26 = vmul.f32 %v1578_v58, %v2352_v56  ;;  %v1362_v9 = vadd.f32 %v1346_v43, %v1281_v15  ;;  %v799_v27 = vmul.f32 %v1809_v1, %v751_v63  ;;  %v1487_v15 = vld [vmem:[%s2643_s3 + $0xe0] sm:$0x3]  ;;  %v1488_v58 = vld [vmem:[%s2643_s3 + $0xe8] sm:$0x3]  ;;  %v758_v43 = vld [vmem:[%s2643_s3 + $0x78] sm:$0x3] }
 0x21b   : > { %v1375_v23 = vadd.f32 %v1374_v54, %v1360_v50  ;;  %v800_v29 = vmul.f32 %v1853_v17, %v752_v62  ;;  %v801_v13 = vmul.f32 %v1883_v30, %v753_v14  ;;  %v802_v35 = vmul.f32 %v1914_v41, %v754_v6  ;;  %v757_v62 = vld [vmem:[%s2643_s3 + $0x70] sm:$0x3]  ;;  %v1499_v6 = vld [vmem:[%s2643_s3 + $0x140] sm:$0x3] }
 0x21c   : > { %v864_v1 = vmul.f32 %v1483_v32, %v1813_v2  ;;  %v865_v19 = vmul.f32 %v1484_v57, %v1887_v31  ;;  %v866_v44 = vmul.f32 %v1485_v7, %v1897_v34  ;;  %v867_v17 = vmul.f32 %v1486_v4, %v1933_v52  ;;  %v1489_v2 = vld [vmem:[%s2643_s3 + $0xf0] sm:$0x3]  ;;  %v2708_v34 = vld [vmem:[#allocation9_spill] sm:$0xff]  ;;  %v1500_v32 = vld [vmem:[%s2643_s3 + $0x148] sm:$0x3] }
 0x21d   : > { %v1363_v3 = vadd.f32 %v1347_v39, %v1282_v22  ;;  %v1364_v30 = vadd.f32 %v1348_v37, %v1283_v45  ;;  %v1365_v63 = vadd.f32 %v1349_v26, %v1284_v61  ;;  %v1376_v41 = vadd.f32 %v1375_v23, %v1361_v21  ;;  %v2709_v22 = vld [vmem:[#allocation7_spill] sm:$0xff]  ;;  %v1501_v39 = vld [vmem:[%s2643_s3 + $0x150] sm:$0x3]  ;;  %v1502_v7 = vld [vmem:[%s2643_s3 + $0x158] sm:$0x3] }
 0x21e   : > { %v803_v31 = vmul.f32 %v1918_v42, %v755_v38  ;;  %v804_v52 = vmul.f32 %v2708_v34, %v756_v28  ;;  %v868_v45 = vmul.f32 %v1487_v15, %v2709_v22  ;;  %v2710_v61 = vld [vmem:[#allocation11_spill] sm:$0xff]  ;;  %v1490_v42 = vld [vmem:[%s2643_s3 + $0xf8] sm:$0x3]  ;;  %v880_v21 = vadd.f32 %v864_v1, %v799_v27  ;;  %v2711_v4 = vld [vmem:[#allocation10_spill] sm:$0xff] }
 0x21f   : > { %v869_v14 = vmul.f32 %v1488_v58, %v2710_v61  ;;  %v1377_v50 = vadd.f32 %v1376_v41, %v1362_v9  ;;  %v881_v54 = vadd.f32 %v865_v19, %v800_v29  ;;  %v882_v57 = vadd.f32 %v866_v44, %v801_v13  ;;  %v2712_v38 = vld [vmem:[#allocation12_spill] sm:$0xff]  ;;  %v1503_v9 = vld [vmem:[%s2643_s3 + $0x160] sm:$0x3]  ;;  %v1504_v27 = vld [vmem:[%s2643_s3 + $0x168] sm:$0x3] }
 0x220   : > { %v805_v37 = vmul.f32 %v2711_v4, %v757_v62  ;;  %v806_v26 = vmul.f32 %v2028_v12, %v758_v43  ;;  %v870_v23 = vmul.f32 %v1489_v2, %v2712_v38  ;;  %v883_v28 = vadd.f32 %v867_v17, %v802_v35  ;;  %v2713_v29 = vld [vmem:[#allocation2_spill] sm:$0xff]  ;;  %v2715_v19 = vld [vmem:[#allocation8_spill] sm:$0xff]  ;;  %v2717_v35 = vld [vmem:[#allocation13_spill] sm:$0xff] }
 0x221   : > { %v1378_v15 = vadd.f32 %v1377_v50, %v1363_v3  ;;  %v945_v13 = vmul.f32 %v1499_v6, %v2713_v29  ;;  %v2714_v58 = vld [vmem:[#allocation6_spill] sm:$0xff]  ;;  %v947_v44 = vmul.f32 %v1501_v39, %v2715_v19  ;;  %v2716_v41 = vld [vmem:[#allocation16_spill] sm:$0xff]  ;;  %v884_v62 = vadd.f32 %v868_v45, %v803_v31  ;;  %v1516_v2 = vld [vmem:[%s2643_s3 + $0x1c8] sm:$0x3] }
 0x222   : > { %v946_v1 = vmul.f32 %v1500_v32, %v2714_v58  ;;  %v871_v12 = vmul.f32 %v1490_v42, %v2716_v41  ;;  %v885_v43 = vadd.f32 %v869_v14, %v804_v52  ;;  %v948_v17 = vmul.f32 %v1502_v7, %v2717_v35  ;;  %v1515_v3 = vld [vmem:[%s2643_s3 + $0x1c0] sm:$0x3]  ;;  %v1517_v34 = vld [vmem:[%s2643_s3 + $0x1d0] sm:$0x3]  ;;  %v1518_v31 = vld [vmem:[%s2643_s3 + $0x1d8] sm:$0x3] }
 0x223   : > { %v1379_v22 = vadd.f32 %v1378_v15, %v1364_v30  ;;  %v961_v61 = vadd.f32 %v945_v13, %v880_v21  ;;  %v963_v32 = vadd.f32 %v947_v44, %v882_v57  ;;  %v2718_v52 = vld [vmem:[#allocation14_spill] sm:$0xff]  ;;  %v2719_v14 = vld [vmem:[#allocation15_spill] sm:$0xff]  ;;  %v1505_v30 = vld [vmem:[%s2643_s3 + $0x170] sm:$0x3]  ;;  %v1027_v38 = vmul.f32 %v1516_v2, %v2064_v40 }
 0x224   : > { %v962_v6 = vadd.f32 %v946_v1, %v881_v54  ;;  %v949_v45 = vmul.f32 %v1503_v9, %v2718_v52  ;;  %v950_v39 = vmul.f32 %v1504_v27, %v2719_v14  ;;  %v964_v50 = vadd.f32 %v948_v17, %v883_v28  ;;  %v1531_v42 = vld [vmem:[%s2643_s3 + $0x240] sm:$0x3]  ;;  %v1506_v21 = vld [vmem:[%s2643_s3 + $0x178] sm:$0x3]  ;;  %v2720_v57 = vld [vmem:[#allocation3_spill] sm:$0xff] }
 0x225   : > { %v1380_v7 = vadd.f32 %v1379_v22, %v1365_v63  ;;  %v1519_v54 = vld [vmem:[%s2643_s3 + $0x1e0] sm:$0x3]  ;;  %v1026_v4 = vmul.f32 %v1515_v3, %v2720_v57  ;;  %v1028_v28 = vmul.f32 %v1517_v34, %v2077_v24  ;;  %v886_v15 = vadd.f32 %v870_v23, %v805_v37  ;;  %v1520_v27 = vld [vmem:[%s2643_s3 + $0x1e8] sm:$0x3]  ;;  %v1533_v58 = vld [vmem:[%s2643_s3 + $0x250] sm:$0x3] }
 0x226   : > { %v887_v63 = vadd.f32 %v871_v12, %v806_v26  ;;  %v965_v9 = vadd.f32 %v949_v45, %v884_v62  ;;  %v1029_v29 = vmul.f32 %v1518_v31, %v2081_v20  ;;  %v1532_v13 = vld [vmem:[%s2643_s3 + $0x248] sm:$0x3]  ;;  %v966_v40 = vadd.f32 %v950_v39, %v885_v43  ;;  %v1534_v23 = vld [vmem:[%s2643_s3 + $0x258] sm:$0x3]  ;;  %v2722_v20 = vld [vmem:[#allocation18_spill] sm:$0xff] }
 0x227   : > { %1381 = vadd.xlane.f32.xlu1 %v1380_v7  ;;  %v1042_v24 = vadd.f32 %v1026_v4, %v961_v61  ;;  %v1043_v37 = vadd.f32 %v1027_v38, %v962_v6  ;;  %v1044_v26 = vadd.f32 %v1028_v28, %v963_v32  ;;  %v2721_v1 = vld [vmem:[#allocation17_spill] sm:$0xff]  ;;  %v952_v44 = vmul.f32 %v1506_v21, %v2722_v20  ;;  %v1521_v41 = vld [vmem:[%s2643_s3 + $0x1f0] sm:$0x3]  ;;  %v1535_v17 = vld [vmem:[%s2643_s3 + $0x260] sm:$0x3] }
 0x228   : > { %v951_v19 = vmul.f32 %v1505_v30, %v2721_v1  ;;  %v1030_v12 = vmul.f32 %v1519_v54, %v2085_v25  ;;  %v1045_v62 = vadd.f32 %v1029_v29, %v964_v50  ;;  %v1522_v43 = vld [vmem:[%s2643_s3 + $0x1f8] sm:$0x3]  ;;  %v1031_v35 = vmul.f32 %v1520_v27, %v2089_v48  ;;  %v1536_v3 = vld [vmem:[%s2643_s3 + $0x268] sm:$0x3]  ;;  %v2723_v2 = vld [vmem:[#allocation4_spill] sm:$0xff] }
 0x229   : > { %v1107_v34 = vmul.f32 %v1531_v42, %v2723_v2  ;;  %v1108_v22 = vmul.f32 %v1532_v13, %v2123_v55  ;;  %v2724_v25 = vld [vmem:[#allocation21_spill] sm:$0xff]  ;;  %v968_v32 = vadd.f32 %v952_v44, %v887_v63  ;;  %v2725_v52 = vld [vmem:[#allocation22_spill] sm:$0xff]  ;;  %v1548_v14 = vld [vmem:[%s2643_s3 + $0x2c8] sm:$0x3] }
 0x22a   : > { %v1109_v61 = vmul.f32 %v1533_v58, %v2724_v25  ;;  %v967_v6 = vadd.f32 %v951_v19, %v886_v15  ;;  %v1046_v31 = vadd.f32 %v1030_v12, %v965_v9  ;;  %v1110_v45 = vmul.f32 %v1534_v23, %v2725_v52  ;;  %v1547_v48 = vld [vmem:[%s2643_s3 + $0x2c0] sm:$0x3]  ;;  %v1549_v39 = vld [vmem:[%s2643_s3 + $0x2d0] sm:$0x3]  ;;  %v1550_v30 = vld [vmem:[%s2643_s3 + $0x2d8] sm:$0x3] }
 0x22b   : > { %v1047_v55 = vadd.f32 %v1031_v35, %v966_v40  ;;  %v1123_v50 = vadd.f32 %v1107_v34, %v1042_v24  ;;  %v1124_v42 = vadd.f32 %v1108_v22, %v1043_v37  ;;  %v2726_v21 = vld [vmem:[#allocation19_spill] sm:$0xff]  ;;  %v2727_v57 = vld [vmem:[#allocation20_spill] sm:$0xff]  ;;  %v1538_v9 = vld [vmem:[%s2643_s3 + $0x278] sm:$0x3]  ;;  %v1189_v37 = vmul.f32 %v1548_v14, %v2179_v51 }
 0x22c   : > { %v1125_v7 = vadd.f32 %v1109_v61, %v1044_v26  ;;  %v1032_v54 = vmul.f32 %v1521_v41, %v2726_v21  ;;  %v1033_v4 = vmul.f32 %v1522_v43, %v2727_v57  ;;  %v1537_v38 = vld [vmem:[%s2643_s3 + $0x270] sm:$0x3]  ;;  %v2728_v28 = vld [vmem:[#allocation23_spill] sm:$0xff]  ;;  %v1126_v63 = vadd.f32 %v1110_v45, %v1045_v62  ;;  %v1551_v13 = vld [vmem:[%s2643_s3 + $0x2e0] sm:$0x3] }
 0x22d   : > { %v1111_v15 = vmul.f32 %v1535_v17, %v2728_v28  ;;  %v2729_v27 = vld [vmem:[#allocation24_spill] sm:$0xff]  ;;  %v1552_v58 = vld [vmem:[%s2643_s3 + $0x2e8] sm:$0x3]  ;;  %v2730_v40 = vld [vmem:[#allocation5_spill] sm:$0xff]  ;;  %v1205_v17 = vadd.f32 %v1189_v37, %v1124_v42 }
 0x22e   : > { %v1112_v29 = vmul.f32 %v1536_v3, %v2729_v27  ;;  %v1188_v24 = vmul.f32 %v1547_v48, %v2730_v40  ;;  %v2731_v26 = vld [vmem:[#allocation27_spill] sm:$0xff]  ;;  %v1048_v1 = vadd.f32 %v1032_v54, %v967_v6  ;;  %v1049_v19 = vadd.f32 %v1033_v4, %v968_v32  ;;  %v2732_v44 = vld [vmem:[#allocation28_spill] sm:$0xff]  ;;  %v1563_v12 = vld [vmem:[%s2643_s3 + $0x340] sm:$0x3] }
 0x22f   : > { %v1190_v23 = vmul.f32 %v1549_v39, %v2731_v26  ;;  %v1127_v20 = vadd.f32 %v1111_v15, %v1046_v31  ;;  %v1191_v41 = vmul.f32 %v1550_v30, %v2732_v44  ;;  %v1564_v62 = vld [vmem:[%s2643_s3 + $0x348] sm:$0x3]  ;;  %v1565_v43 = vld [vmem:[%s2643_s3 + $0x350] sm:$0x3]  ;;  %v1566_v2 = vld [vmem:[%s2643_s3 + $0x358] sm:$0x3] }
 0x230   : > { %v1128_v51 = vadd.f32 %v1112_v29, %v1047_v55  ;;  %v1204_v35 = vadd.f32 %v1188_v24, %v1123_v50  ;;  %v2733_v34 = vld [vmem:[#allocation25_spill] sm:$0xff]  ;;  %v2734_v25 = vld [vmem:[#allocation26_spill] sm:$0xff]  ;;  %v1553_v6 = vld [vmem:[%s2643_s3 + $0x2f0] sm:$0x3]  ;;  %v1269_v55 = vmul.f32 %v1563_v12, %v2240_v47  ;;  %v1270_v50 = vmul.f32 %v1564_v62, %v2244_v8 }
 0x231   : > { %v1206_v3 = vadd.f32 %v1190_v23, %v1125_v7  ;;  %v1113_v22 = vmul.f32 %v1537_v38, %v2733_v34  ;;  %v1114_v61 = vmul.f32 %v1538_v9, %v2734_v25  ;;  %v2735_v32 = vld [vmem:[#allocation29_spill] sm:$0xff]  ;;  %v1207_v52 = vadd.f32 %v1191_v41, %v1126_v63  ;;  %v2736_v48 = vld [vmem:[#allocation30_spill] sm:$0xff]  ;;  %v1568_v57 = vld [vmem:[%s2643_s3 + $0x368] sm:$0x3] }
 0x232   : > { %v1192_v31 = vmul.f32 %v1551_v13, %v2735_v32  ;;  %v1554_v45 = vld [vmem:[%s2643_s3 + $0x2f8] sm:$0x3]  ;;  %v1193_v14 = vmul.f32 %v1552_v58, %v2736_v48  ;;  %v1567_v39 = vld [vmem:[%s2643_s3 + $0x360] sm:$0x3]  ;;  %v1271_v42 = vmul.f32 %v1565_v43, %v2257_v5  ;;  %v1272_v4 = vmul.f32 %v1566_v2, %v2261_v46  ;;  %v1580_v47 = vld [vmem:[%s2643_s3 + $0x3c8] sm:$0x3] }
 0x233   : > { %v1579_v7 = vld [vmem:[%s2643_s3 + $0x3c0] sm:$0x3]  ;;  %v1129_v30 = vadd.f32 %v1113_v22, %v1048_v1  ;;  %v1130_v21 = vadd.f32 %v1114_v61, %v1049_v19  ;;  %v1581_v8 = vld [vmem:[%s2643_s3 + $0x3d0] sm:$0x3]  ;;  %v1285_v38 = vadd.f32 %v1269_v55, %v1204_v35  ;;  %v1286_v28 = vadd.f32 %v1270_v50, %v1205_v17  ;;  %v1582_v63 = vld [vmem:[%s2643_s3 + $0x3d8] sm:$0x3] }
 0x234   : > { %v1208_v54 = vadd.f32 %v1192_v31, %v1127_v20  ;;  %v1209_v5 = vadd.f32 %v1193_v14, %v1128_v51  ;;  %v1287_v15 = vadd.f32 %v1271_v42, %v1206_v3  ;;  %v2737_v9 = vld [vmem:[#allocation31_spill] sm:$0xff]  ;;  %v2738_v29 = vld [vmem:[#allocation32_spill] sm:$0xff]  ;;  %v1273_v13 = vmul.f32 %v1567_v39, %v2265_v60  ;;  %v1570_v24 = vld [vmem:[%s2643_s3 + $0x378] sm:$0x3] }
 0x235   : > { %v1194_v27 = vmul.f32 %v1553_v6, %v2737_v9  ;;  %v1195_v46 = vmul.f32 %v1554_v45, %v2738_v29  ;;  %v1288_v58 = vadd.f32 %v1272_v4, %v1207_v52  ;;  %v1569_v40 = vld [vmem:[%s2643_s3 + $0x370] sm:$0x3]  ;;  %v1274_v37 = vmul.f32 %v1568_v57, %v2269_v11  ;;  %v1583_v44 = vld [vmem:[%s2643_s3 + $0x3e0] sm:$0x3]  ;;  %v1584_v41 = vld [vmem:[%s2643_s3 + $0x3e8] sm:$0x3] }
 0x236   : > { %v1350_v26 = vmul.f32 %v1579_v7, %v2306_v18  ;;  %v1351_v23 = vmul.f32 %v1580_v47, %v2310_v16  ;;  %v1352_v1 = vmul.f32 %v1581_v8, %v2320_v49  ;;  %v1289_v60 = vadd.f32 %v1273_v13, %v1208_v54  ;;  %v228_v57 = vld [vmem:[%s2644_s4 + $0x8] sm:$0x3] }
 0x237   : > { %v1210_v19 = vadd.f32 %v1194_v27, %v1129_v30  ;;  %v1211_v20 = vadd.f32 %v1195_v46, %v1130_v21  ;;  %v1353_v12 = vmul.f32 %v1582_v63, %v2324_v59  ;;  %v1290_v11 = vadd.f32 %v1274_v37, %v1209_v5  ;;  %v1585_v59 = vld [vmem:[%s2643_s3 + $0x3f0] sm:$0x3] }
 0x238   : > { %v1366_v62 = vadd.f32 %v1350_v26, %v1285_v38  ;;  %v1367_v18 = vadd.f32 %v1351_v23, %v1286_v28  ;;  %v1368_v43 = vadd.f32 %v1352_v1, %v1287_v15  ;;  %v1275_v16 = vmul.f32 %v1569_v40, %v2282_v33  ;;  %v1586_v33 = vld [vmem:[%s2643_s3 + $0x3f8] sm:$0x3] }
 0x239   : > { %v1276_v49 = vmul.f32 %v1570_v24, %v2286_v53  ;;  %v1369_v51 = vadd.f32 %v1353_v12, %v1288_v58  ;;  %v1354_v35 = vmul.f32 %v1583_v44, %v2328_v0  ;;  %v1355_v17 = vmul.f32 %v1584_v41, %v2335_v10 }
 0x23a   : > { %v1384_v3 = vsel %vm1383_vm4, %v1366_v62, 0.0  ;;  %v1385_v2 = vsel %vm1383_vm4, %v1367_v18, 0.0  ;;  %v1291_v34 = vadd.f32 %v1275_v16, %v1210_v19  ;;  %v1387_v0 = vsel %vm1383_vm4, %v1368_v43, 0.0 }
 0x23b   : > { %v1292_v22 = vadd.f32 %v1276_v49, %v1211_v20  ;;  %v1386_v53 = vadd.f32 %v1385_v2, %v1384_v3  ;;  %v1370_v25 = vadd.f32 %v1354_v35, %v1289_v60  ;;  %v1371_v61 = vadd.f32 %v1355_v17, %v1290_v11 }
 0x23c   : > { %v1389_v10 = vsel %vm1383_vm4, %v1369_v51, 0.0  ;;  %v1356_v32 = vmul.f32 %v1585_v59, %v2348_v36  ;;  %v1357_v31 = vmul.f32 %v1586_v33, %v2352_v56  ;;  %v227_v36 = vld [vmem:[%s2644_s4] sm:$0xff] }
 0x23d   : > { %v1388_v6 = vadd.f32 %v1387_v0, %v1386_v53  ;;  %v1391_v14 = vsel %vm1383_vm4, %v1370_v25, 0.0  ;;  %v1393_v39 = vsel %vm1383_vm4, %v1371_v61, 0.0 }
 0x23e   : > { %v1372_v45 = vadd.f32 %v1356_v32, %v1291_v34  ;;  %v1373_v48 = vadd.f32 %v1357_v31, %v1292_v22 }
 0x23f   : > { %v1390_v52 = vadd.f32 %v1389_v10, %v1388_v6 }
 0x240   : > { %v1395_v42 = vsel %vm1383_vm4, %v1372_v45, 0.0  ;;  %v1397_v7 = vsel %vm1383_vm4, %v1373_v48, 0.0 }
 0x241   : > { %v1392_v55 = vadd.f32 %v1391_v14, %v1390_v52 }
 0x243   : > { %v1394_v50 = vadd.f32 %v1393_v39, %v1392_v55 }
 0x245   : > { %v1396_v30 = vadd.f32 %v1395_v42, %v1394_v50 }
 0x247   : > { %v1398_v21 = vadd.f32 %v1397_v7, %v1396_v30 }
 0x249   : > { %1399 = vadd.xlane.f32.xlu0 %v1398_v21 }
 0x2b4   : > { %v1382_v56 = vpop.xlane.xlu1 %1381 }
 0x2b5   : > { %v1401_v54 = vadd.f32 %v1382_v56, %v227_v36 }
 0x2b7   : > { %1404 = vst.msk [vmem:[%s224_s13] sm:$0xff] %vm1403_vm5, %v1401_v54 }
 0x2d6   : > { %v1400_v4 = vpop.xlane.xlu0 %1399 }
 0x2d7   : > { %v1402_v47 = vadd.f32 %v1400_v4, %v228_v57 }
 0x2d9   : > { %1406 = vst.msk [vmem:[%s224_s13 + $0x8] sm:$0x3] %vm1405_vm6, %v1402_v47 }
 0x2da PF: > { %s15_s18 = sadd.s32 1, %s1666_s18  }
 0x2db   : > { %p12_p4 = scmp.ge.s32.totalorder %s15_s18, 4  }
 0x2dd   :  { %14 = sbr.rel (!%p12_p4) target bundleno = 1 (0x1), region = 77 }

</bundles_post_ra>
